<compile_context>
chip_gen: v5e
topology: v5e:2x2
jax: 0.10.0
libtpu: 0.0.40
codegen_flags: <defaults>
</compile_context>

<pallas_src>
import jax
import jax.numpy as jnp
from jax.experimental import pallas as pl
from jax.experimental.pallas import tpu as pltpu


# ------------------------------ Pallas kernel ------------------------------ #
def _subgraph_gnn_kernel(xw0_ref, walk_ref, hop1_ref, hop2_ref, hop3_ref,
                         xw123_ref, w1w_ref, b1_ref, w2_ref, b2_ref,
                         o_ref, h1_ref):
    """Fused forward of all four hop branches for one row tile of nodes.

    xw0_ref  : [tm, H1]      row tile of x @ W1x_0   (branch-0 x-part, no hop matmul)
    walk_ref : [tm, Wd]      row tile of random-walk features
    hopK_ref : [tm, N]       row tile of the dense hop-K operator (streamed, bf16)
    xw123_ref: [3, N, H1]    x @ W1x_k for k=1..3 (VMEM-resident, bf16)
    w1w_ref  : [Wd, 4*H1]    walk-feature rows of all four Linear1 weights (concat)
    b1_ref   : [1, 4*H1]     concat of the four Linear1 biases
    w2_ref   : [4*H1, H2]    vertically stacked Linear2 weights
    b2_ref   : [1, H2]       sum of the four Linear2 biases
    o_ref    : [tm, H2]      output row tile (sum over the 4 branches)
    h1_ref   : [tm, 4*H1]    f32 scratch holding all four branches' h1 side by side
    """
    h1d = xw0_ref.shape[1]

    # Reassociated x-parts of Linear1: one [tm,N]@[N,H1] matmul per hop branch,
    # written into lane offset k*H1 of the shared h1 tile (no in-kernel concat).
    h1_ref[:, 0 * h1d:1 * h1d] = xw0_ref[...].astype(jnp.float32)
    h1_ref[:, 1 * h1d:2 * h1d] = jnp.dot(hop1_ref[...], xw123_ref[0],
                                         preferred_element_type=jnp.float32)
    h1_ref[:, 2 * h1d:3 * h1d] = jnp.dot(hop2_ref[...], xw123_ref[1],
                                         preferred_element_type=jnp.float32)
    h1_ref[:, 3 * h1d:4 * h1d] = jnp.dot(hop3_ref[...], xw123_ref[2],
                                         preferred_element_type=jnp.float32)

    # Walk-feature part of Linear1 for all four branches in ONE lane-dense matmul.
    wpart = jnp.dot(walk_ref[...], w1w_ref[...], preferred_element_type=jnp.float32)

    # Bias + ReLU (Dropout is identity in eval mode).
    # TODO(synk): nn.Dropout is train-time stochastic; eval-mode forward => identity.
    h1 = jnp.maximum(h1_ref[...] + wpart + b1_ref[...], 0.0)          # [tm, 4*H1]

    # Fused Linear2 + branch sum: single K=4*H1 matmul, pre-summed output bias.
    o_ref[...] = (jnp.dot(h1, w2_ref[...], preferred_element_type=jnp.float32)
                  + b2_ref[...]).astype(o_ref.dtype)


# -------------------------------- wrapper ---------------------------------- #
def _round_up(a, m):
    return ((a + m - 1) // m) * m


def subgraph_gnn_forward(params, x, walk_feats, hop1, hop2, hop3,
                         *, walk_order=30, tm=None, stream_dtype=jnp.bfloat16):
    """Fused Subgraph_GNN forward: one pallas_call, row-tiled over nodes."""
    n, dx = x.shape
    x = x.astype(jnp.float32)
    walk = walk_feats[:, :walk_order].astype(jnp.float32)
    wd = walk.shape[1]

    h1_dim = params[0]["w1"].shape[1]
    h2_dim = params[0]["w2"].shape[1]

    # Reassociation: (hop_k @ x) @ W1x_k == hop_k @ (x @ W1x_k).  Precompute the
    # small [N, H1] products once; they replace the full x as the resident operand.
    w1 = [params[k]["w1"].astype(jnp.float32) for k in range(4)]
    xw0 = x @ w1[0][:dx, :]                                        # [N, H1]  (f32)
    xw123 = jnp.stack([x @ w1[k][:dx, :] for k in (1, 2, 3)])      # [3, N, H1]
    xw123 = xw123.astype(stream_dtype)

    # Cross-branch fused weights / biases.
    w1w_cat = jnp.concatenate([w1[k][dx:dx + wd, :] for k in range(4)], axis=1)   # [Wd, 4*H1]
    b1_cat = jnp.concatenate([params[k]["b1"].astype(jnp.float32)
                              for k in range(4)])[None, :]                         # [1, 4*H1]
    w2_cat = jnp.concatenate([params[k]["w2"].astype(jnp.float32)
                              for k in range(4)], axis=0)                          # [4*H1, H2]
    b2_sum = sum(params[k]["b2"].astype(jnp.float32) for k in range(4))[None, :]   # [1, H2]

    # Stream the only O(N^2) operands in bf16 (no-op if the caller already holds bf16).
    hop1 = hop1.astype(stream_dtype)
    hop2 = hop2.astype(stream_dtype)
    hop3 = hop3.astype(stream_dtype)

    # Row tiling: tm multiple of 8; keep >= 2 grid steps (dual-TC on v7x).
    if tm is None:
        tm = min(256, _round_up(n, 8))
        if _round_up(n, tm) // tm < 2 and n > 8:
            tm = max(8, _round_up((n + 1) // 2, 8))
    n_pad = _round_up(n, tm)
    if n_pad != n:
        pad = n_pad - n
        xw0 = jnp.pad(xw0, ((0, pad), (0, 0)))
        walk = jnp.pad(walk, ((0, pad), (0, 0)))
        # Only the streamed ROW dim needs padding; the contraction dim stays n.
        hop1 = jnp.pad(hop1, ((0, pad), (0, 0)))
        hop2 = jnp.pad(hop2, ((0, pad), (0, 0)))
        hop3 = jnp.pad(hop3, ((0, pad), (0, 0)))

    # Explicit VMEM budget (double-buffered streams + resident weights + scratch).
    itemsize_s = jnp.dtype(stream_dtype).itemsize
    resident_bytes = (3 * n * h1_dim * itemsize_s
                      + (wd + h2_dim) * 4 * h1_dim * 4
                      + (4 * h1_dim + h2_dim) * 4)
    streamed_bytes = tm * (3 * n * itemsize_s + (h1_dim + wd + h2_dim) * 4)
    scratch_bytes = tm * 4 * h1_dim * 4
    vmem_need = 2 * (resident_bytes + streamed_bytes) + scratch_bytes
    vmem_limit = int(min(max(2 * vmem_need, 32 * 1024 * 1024), 64 * 1024 * 1024))

    out = pl.pallas_call(
        _subgraph_gnn_kernel,
        out_shape=jax.ShapeDtypeStruct((n_pad, h2_dim), jnp.float32),
        grid=(n_pad // tm,),
        in_specs=[
            pl.BlockSpec((tm, h1_dim), lambda i: (i, 0)),          # xw0: row tile
            pl.BlockSpec((tm, wd), lambda i: (i, 0)),              # walk: row tile
            pl.BlockSpec((tm, n), lambda i: (i, 0)),               # hop1: row tile (bf16)
            pl.BlockSpec((tm, n), lambda i: (i, 0)),               # hop2: row tile (bf16)
            pl.BlockSpec((tm, n), lambda i: (i, 0)),               # hop3: row tile (bf16)
            pl.BlockSpec((3, n, h1_dim), lambda i: (0, 0, 0)),     # xw123: resident
            pl.BlockSpec((wd, 4 * h1_dim), lambda i: (0, 0)),      # W1 walk rows: resident
            pl.BlockSpec((1, 4 * h1_dim), lambda i: (0, 0)),       # b1 concat: resident
            pl.BlockSpec((4 * h1_dim, h2_dim), lambda i: (0, 0)),  # W2 stacked: resident
            pl.BlockSpec((1, h2_dim), lambda i: (0, 0)),           # b2 summed: resident
        ],
        out_specs=pl.BlockSpec((tm, h2_dim), lambda i: (i, 0)),
        scratch_shapes=[pltpu.VMEM((tm, 4 * h1_dim), jnp.float32)],
        compiler_params=pltpu.CompilerParams(
            dimension_semantics=("parallel",),      # dual-TC sharding on v7x
            vmem_limit_bytes=vmem_limit,
        ),
    )(xw0, walk, hop1, hop2, hop3, xw123, w1w_cat, b1_cat, w2_cat, b2_sum)
    return out[:n]


# --------------------------- pure-JAX reference ----------------------------- #
def subgraph_gnn_forward_ref(params, x, walk_feats, hop1, hop2, hop3, walk_order=30):
    walk = walk_feats[:, :walk_order]
    hops = [None, hop1, hop2, hop3]
    out = 0.0
    for k in range(4):
        a = x if k == 0 else hops[k] @ x
        feats = jnp.concatenate([a, walk], axis=1)
        h = jnp.maximum(feats @ params[k]["w1"] + params[k]["b1"], 0.0)
        out = out + (h @ params[k]["w2"] + params[k]["b2"])
    return out


# ------------------------------- init helpers ------------------------------- #
def init_params(key, in_dim, hidden1, hidden2):
    params = {}
    lim1 = in_dim ** -0.5
    lim2 = hidden1 ** -0.5
    keys = jax.random.split(key, 4)
    for k in range(4):
        k1, kb1, k2, kb2 = jax.random.split(keys[k], 4)
        params[k] = {
            "w1": jax.random.uniform(k1, (in_dim, hidden1), jnp.float32, -lim1, lim1),
            "b1": jax.random.uniform(kb1, (hidden1,), jnp.float32, -lim1, lim1),
            "w2": jax.random.uniform(k2, (hidden1, hidden2), jnp.float32, -lim2, lim2),
            "b2": jax.random.uniform(kb2, (hidden2,), jnp.float32, -lim2, lim2),
        }
    return params


# ---------------------------------- main ------------------------------------ #
if __name__ == "__main__":
    key = jax.random.PRNGKey(0)
    kx, kw, ke, kp = jax.random.split(key, 4)

    N = 16
    X_DIM = 6
    WALK_ORDER = 30
    HIDDEN1 = 32
    HIDDEN2 = 32
    IN_DIM = X_DIM + WALK_ORDER          # Linear input = node feats + walk feats

    x = jax.random.normal(kx, (N, X_DIM), jnp.float32)
    walk_feats = jax.random.normal(kw, (N, WALK_ORDER + 4), jnp.float32)  # sliced to 30

    # Deterministic dense "k-hop" operators from a random graph.
    probs = jax.random.uniform(ke, (N, N))
    adj = (probs < 0.2).astype(jnp.float32)
    adj = jnp.maximum(adj, adj.T)
    adj = adj + jnp.eye(N, dtype=jnp.float32)
    adj = adj / jnp.sum(adj, axis=1, keepdims=True)     # row-normalized
    hop1 = adj
    hop2 = adj @ adj
    hop3 = hop2 @ adj

    params = init_params(kp, IN_DIM, HIDDEN1, HIDDEN2)

    # tm=8 -> grid=(2,) exercises the row-tiled / parallel-grid path even at toy N.
    out = subgraph_gnn_forward(params, x, walk_feats, hop1, hop2, hop3,
                               walk_order=WALK_ORDER, tm=8)
    out = jax.block_until_ready(out)

    ref = subgraph_gnn_forward_ref(params, x, walk_feats, hop1, hop2, hop3, WALK_ORDER)
    assert out.shape == (N, HIDDEN2), out.shape
    # Tolerance sized for bf16 streaming of the hop operators (f32 accumulation).
    assert jnp.allclose(out, ref, rtol=2e-2, atol=2e-2), \
        float(jnp.max(jnp.abs(out - ref)))
    print("KERNEL_OK")
</pallas_src>

<mosaic_0001>
module attributes {stable_mosaic.version = 11 : i64} {
  func.func @_subgraph_gnn_kernel(%arg0: i32, %arg1: memref<8x32xf32, #tpu.memory_space<vmem>>, %arg2: memref<8x30xf32, #tpu.memory_space<vmem>>, %arg3: memref<8x16xbf16, #tpu.memory_space<vmem>>, %arg4: memref<8x16xbf16, #tpu.memory_space<vmem>>, %arg5: memref<8x16xbf16, #tpu.memory_space<vmem>>, %arg6: memref<3x16x32xbf16, #tpu.memory_space<vmem>>, %arg7: memref<30x128xf32, #tpu.memory_space<vmem>>, %arg8: memref<1x128xf32, #tpu.memory_space<vmem>>, %arg9: memref<128x32xf32, #tpu.memory_space<vmem>>, %arg10: memref<1x32xf32, #tpu.memory_space<vmem>>, %arg11: memref<8x32xf32, #tpu.memory_space<vmem>>, %arg12: memref<8x128xf32, #tpu.memory_space<vmem>>) attributes {dimension_semantics = [#tpu.dimension_semantics<parallel>], iteration_bounds = array<i64: 2>, scalar_prefetch = 0 : i64, scratch_operands = 1 : i64, tpu.core_type = #tpu.core_type<tc>, window_params = [{transform_indices = @transform_0, window_bounds = array<i64: 8, 32>}, {transform_indices = @transform_1, window_bounds = array<i64: 8, 30>}, {transform_indices = @transform_2, window_bounds = array<i64: 8, 16>}, {transform_indices = @transform_3, window_bounds = array<i64: 8, 16>}, {transform_indices = @transform_4, window_bounds = array<i64: 8, 16>}, {pipeline_mode = #tpu.pipeline_mode<synchronous>, transform_indices = @transform_5, window_bounds = array<i64: 3, 16, 32>}, {pipeline_mode = #tpu.pipeline_mode<synchronous>, transform_indices = @transform_6, window_bounds = array<i64: 30, 128>}, {pipeline_mode = #tpu.pipeline_mode<synchronous>, transform_indices = @transform_7, window_bounds = array<i64: 1, 128>}, {pipeline_mode = #tpu.pipeline_mode<synchronous>, transform_indices = @transform_8, window_bounds = array<i64: 128, 32>}, {pipeline_mode = #tpu.pipeline_mode<synchronous>, transform_indices = @transform_9, window_bounds = array<i64: 1, 32>}, {transform_indices = @transform_10, window_bounds = array<i64: 8, 32>}]} {
    %c0 = arith.constant 0 : index
    %c0_0 = arith.constant 0 : index
    %0 = vector.load %arg1[%c0, %c0_0] : memref<8x32xf32, #tpu.memory_space<vmem>>, vector<8x32xf32>
    %c0_1 = arith.constant 0 : index
    %c0_2 = arith.constant 0 : index
    %1 = vector.load %arg12[%c0_1, %c0_2] : memref<8x128xf32, #tpu.memory_space<vmem>>, vector<8x32xf32>
    tpu.vector_store %arg12[%c0_1, %c0_2], %0 {strides = array<i32>} : memref<8x128xf32, #tpu.memory_space<vmem>>, vector<8x32xf32>,
    %c0_3 = arith.constant 0 : index
    %c0_4 = arith.constant 0 : index
    %2 = vector.load %arg3[%c0_3, %c0_4] : memref<8x16xbf16, #tpu.memory_space<vmem>>, vector<8x16xbf16>
    %c0_5 = arith.constant 0 : index
    %c0_6 = arith.constant 0 : index
    %c0_7 = arith.constant 0 : index
    %3 = vector.load %arg6[%c0_5, %c0_6, %c0_7] : memref<3x16x32xbf16, #tpu.memory_space<vmem>>, vector<1x16x32xbf16>
    %4 = vector.shape_cast %3 : vector<1x16x32xbf16> to vector<16x32xbf16>
    %cst = arith.constant dense<0.000000e+00> : vector<8x32xf32>
    %5 = tpu.matmul %2, %4, %cst {dimension_numbers = #tpu.dot_dimension_numbers<[1], [0], [0], [1], [0, 0, 1, 1], [], []>} : vector<8x16xbf16>, vector<16x32xbf16>, vector<8x32xf32> -> vector<8x32xf32>
    %c0_8 = arith.constant 0 : index
    %c32 = arith.constant 32 : index
    %6 = vector.load %arg12[%c0_8, %c32] : memref<8x128xf32, #tpu.memory_space<vmem>>, vector<8x32xf32>
    tpu.vector_store %arg12[%c0_8, %c32], %5 {strides = array<i32>} : memref<8x128xf32, #tpu.memory_space<vmem>>, vector<8x32xf32>,
    %c0_9 = arith.constant 0 : index
    %c0_10 = arith.constant 0 : index
    %7 = vector.load %arg4[%c0_9, %c0_10] : memref<8x16xbf16, #tpu.memory_space<vmem>>, vector<8x16xbf16>
    %c1 = arith.constant 1 : index
    %c0_11 = arith.constant 0 : index
    %c0_12 = arith.constant 0 : index
    %8 = vector.load %arg6[%c1, %c0_11, %c0_12] : memref<3x16x32xbf16, #tpu.memory_space<vmem>>, vector<1x16x32xbf16>
    %9 = vector.shape_cast %8 : vector<1x16x32xbf16> to vector<16x32xbf16>
    %cst_13 = arith.constant dense<0.000000e+00> : vector<8x32xf32>
    %10 = tpu.matmul %7, %9, %cst_13 {dimension_numbers = #tpu.dot_dimension_numbers<[1], [0], [0], [1], [0, 0, 1, 1], [], []>} : vector<8x16xbf16>, vector<16x32xbf16>, vector<8x32xf32> -> vector<8x32xf32>
    %c0_14 = arith.constant 0 : index
    %c64 = arith.constant 64 : index
    %11 = vector.load %arg12[%c0_14, %c64] : memref<8x128xf32, #tpu.memory_space<vmem>>, vector<8x32xf32>
    tpu.vector_store %arg12[%c0_14, %c64], %10 {strides = array<i32>} : memref<8x128xf32, #tpu.memory_space<vmem>>, vector<8x32xf32>,
    %c0_15 = arith.constant 0 : index
    %c0_16 = arith.constant 0 : index
    %12 = vector.load %arg5[%c0_15, %c0_16] : memref<8x16xbf16, #tpu.memory_space<vmem>>, vector<8x16xbf16>
    %c2 = arith.constant 2 : index
    %c0_17 = arith.constant 0 : index
    %c0_18 = arith.constant 0 : index
    %13 = vector.load %arg6[%c2, %c0_17, %c0_18] : memref<3x16x32xbf16, #tpu.memory_space<vmem>>, vector<1x16x32xbf16>
    %14 = vector.shape_cast %13 : vector<1x16x32xbf16> to vector<16x32xbf16>
    %cst_19 = arith.constant dense<0.000000e+00> : vector<8x32xf32>
    %15 = tpu.matmul %12, %14, %cst_19 {dimension_numbers = #tpu.dot_dimension_numbers<[1], [0], [0], [1], [0, 0, 1, 1], [], []>} : vector<8x16xbf16>, vector<16x32xbf16>, vector<8x32xf32> -> vector<8x32xf32>
    %c0_20 = arith.constant 0 : index
    %c96 = arith.constant 96 : index
    %16 = vector.load %arg12[%c0_20, %c96] : memref<8x128xf32, #tpu.memory_space<vmem>>, vector<8x32xf32>
    tpu.vector_store %arg12[%c0_20, %c96], %15 {strides = array<i32>} : memref<8x128xf32, #tpu.memory_space<vmem>>, vector<8x32xf32>,
    %c0_21 = arith.constant 0 : index
    %c0_22 = arith.constant 0 : index
    %17 = vector.load %arg2[%c0_21, %c0_22] : memref<8x30xf32, #tpu.memory_space<vmem>>, vector<8x30xf32>
    %c0_23 = arith.constant 0 : index
    %c0_24 = arith.constant 0 : index
    %18 = vector.load %arg7[%c0_23, %c0_24] : memref<30x128xf32, #tpu.memory_space<vmem>>, vector<30x128xf32>
    %cst_25 = arith.constant dense<0.000000e+00> : vector<8x128xf32>
    %19 = tpu.matmul %17, %18, %cst_25 {dimension_numbers = #tpu.dot_dimension_numbers<[1], [0], [0], [1], [0, 0, 1, 1], [], []>} : vector<8x30xf32>, vector<30x128xf32>, vector<8x128xf32> -> vector<8x128xf32>
    %c0_26 = arith.constant 0 : index
    %c0_27 = arith.constant 0 : index
    %20 = vector.load %arg12[%c0_26, %c0_27] : memref<8x128xf32, #tpu.memory_space<vmem>>, vector<8x128xf32>
    %21 = arith.addf %20, %19 : vector<8x128xf32>
    %c0_28 = arith.constant 0 : index
    %c0_29 = arith.constant 0 : index
    %22 = vector.load %arg8[%c0_28, %c0_29] : memref<1x128xf32, #tpu.memory_space<vmem>>, vector<1x128xf32>
    %23 = vector.broadcast %22 : vector<1x128xf32> to vector<8x128xf32>
    %24 = arith.addf %21, %23 : vector<8x128xf32>
    %cst_30 = arith.constant 0.000000e+00 : f32
    %25 = vector.broadcast %cst_30 : f32 to vector<8x128xf32>
    %26 = arith.maximumf %24, %25 : vector<8x128xf32>
    %c0_31 = arith.constant 0 : index
    %c0_32 = arith.constant 0 : index
    %27 = vector.load %arg9[%c0_31, %c0_32] : memref<128x32xf32, #tpu.memory_space<vmem>>, vector<128x32xf32>
    %cst_33 = arith.constant dense<0.000000e+00> : vector<8x32xf32>
    %28 = tpu.matmul %26, %27, %cst_33 {dimension_numbers = #tpu.dot_dimension_numbers<[1], [0], [0], [1], [0, 0, 1, 1], [], []>} : vector<8x128xf32>, vector<128x32xf32>, vector<8x32xf32> -> vector<8x32xf32>
    %c0_34 = arith.constant 0 : index
    %c0_35 = arith.constant 0 : index
    %29 = vector.load %arg10[%c0_34, %c0_35] : memref<1x32xf32, #tpu.memory_space<vmem>>, vector<1x32xf32>
    %30 = vector.broadcast %29 : vector<1x32xf32> to vector<8x32xf32>
    %31 = arith.addf %28, %30 : vector<8x32xf32>
    %c0_36 = arith.constant 0 : index
    %c0_37 = arith.constant 0 : index
    %32 = vector.load %arg11[%c0_36, %c0_37] : memref<8x32xf32, #tpu.memory_space<vmem>>, vector<8x32xf32>
    tpu.vector_store %arg11[%c0_36, %c0_37], %31 {strides = array<i32>} : memref<8x32xf32, #tpu.memory_space<vmem>>, vector<8x32xf32>,
    return
  }
  func.func @transform_0(%arg0: i32) -> (i32, i32) {
    %c0_i32 = arith.constant 0 : i32
    %c0_i32_0 = arith.constant 0 : i32
    return %arg0, %c0_i32 : i32, i32
  }
  func.func @transform_1(%arg0: i32) -> (i32, i32) {
    %c0_i32 = arith.constant 0 : i32
    %c0_i32_0 = arith.constant 0 : i32
    return %arg0, %c0_i32 : i32, i32
  }
  func.func @transform_2(%arg0: i32) -> (i32, i32) {
    %c0_i32 = arith.constant 0 : i32
    %c0_i32_0 = arith.constant 0 : i32
    return %arg0, %c0_i32 : i32, i32
  }
  func.func @transform_3(%arg0: i32) -> (i32, i32) {
    %c0_i32 = arith.constant 0 : i32
    %c0_i32_0 = arith.constant 0 : i32
    return %arg0, %c0_i32 : i32, i32
  }
  func.func @transform_4(%arg0: i32) -> (i32, i32) {
    %c0_i32 = arith.constant 0 : i32
    %c0_i32_0 = arith.constant 0 : i32
    return %arg0, %c0_i32 : i32, i32
  }
  func.func @transform_5(%arg0: i32) -> (i32, i32, i32) {
    %c0_i32 = arith.constant 0 : i32
    %c0_i32_0 = arith.constant 0 : i32
    %c0_i32_1 = arith.constant 0 : i32
    %c0_i32_2 = arith.constant 0 : i32
    return %c0_i32, %c0_i32_0, %c0_i32_1 : i32, i32, i32
  }
  func.func @transform_6(%arg0: i32) -> (i32, i32) {
    %c0_i32 = arith.constant 0 : i32
    %c0_i32_0 = arith.constant 0 : i32
    %c0_i32_1 = arith.constant 0 : i32
    return %c0_i32, %c0_i32_0 : i32, i32
  }
  func.func @transform_7(%arg0: i32) -> (i32, i32) {
    %c0_i32 = arith.constant 0 : i32
    %c0_i32_0 = arith.constant 0 : i32
    %c0_i32_1 = arith.constant 0 : i32
    return %c0_i32, %c0_i32_0 : i32, i32
  }
  func.func @transform_8(%arg0: i32) -> (i32, i32) {
    %c0_i32 = arith.constant 0 : i32
    %c0_i32_0 = arith.constant 0 : i32
    %c0_i32_1 = arith.constant 0 : i32
    return %c0_i32, %c0_i32_0 : i32, i32
  }
  func.func @transform_9(%arg0: i32) -> (i32, i32) {
    %c0_i32 = arith.constant 0 : i32
    %c0_i32_0 = arith.constant 0 : i32
    %c0_i32_1 = arith.constant 0 : i32
    return %c0_i32, %c0_i32_0 : i32, i32
  }
  func.func @transform_10(%arg0: i32) -> (i32, i32) {
    %c0_i32 = arith.constant 0 : i32
    %c0_i32_0 = arith.constant 0 : i32
    return %arg0, %c0_i32 : i32, i32
  }
}

</mosaic_0001>

<bundles_post_ra>
// kernel: tpu_custom_call.1
= control target key start
LH: loop header
LB: loop body
LE: loop exit
PB: predicated region body
PF: predicated region fallthrough
CT: control target
= control target key end

     0   :  { %s1110_s0 = inlined_call_operand.vmem [shape: f32[16,32], index: 0, kind: input, shape index: {}]   ;;  %s1111_s1 = inlined_call_operand.vmem [shape: f32[16,30], index: 1, kind: input, shape index: {}]   ;;  %s1112_s2 = inlined_call_operand.vmem [shape: bf16[16,16], index: 2, kind: input, shape index: {}]   ;;  %s1113_s3 = inlined_call_operand.vmem [shape: bf16[16,16], index: 3, kind: input, shape index: {}]   ;;  %s1114_s4 = inlined_call_operand.vmem [shape: bf16[16,16], index: 4, kind: input, shape index: {}]   ;;  %s1115_s5 = inlined_call_operand.vmem [shape: bf16[3,16,32], index: 5, kind: input, shape index: {}]   ;;  %s1116_s6 = inlined_call_operand.vmem [shape: f32[30,128], index: 6, kind: input, shape index: {}]   ;;  %s1117_s7 = inlined_call_operand.vmem [shape: f32[1,128], index: 7, kind: input, shape index: {}]   ;;  %s1118_s8 = inlined_call_operand.vmem [shape: f32[128,32], index: 8, kind: input, shape index: {}]   ;;  %s1119_s9 = inlined_call_operand.vmem [shape: f32[1,32], index: 9, kind: input, shape index: {}]   ;;  %s1120_s10 = inlined_call_operand.hbm [shape: f32[16,32], index: 10, kind: output, shape index: {}]  }
   0x1   :  { %1121 = sst [smem:[#allocation7_spill]] %s1115_s5 }
   0x2   :  { %15 = vsyncpa [#allocation4], 0 }
   0x3   :  { %17 = vsyncpa [#allocation4 + $0x1], 0  ;;  %s932_s13 = smov 0   ;;  %s934_s14 = smov 0  }
   0x4   :  { %s936_s15 = smov 0   ;;  %s938_s16 = smov 0  }
   0x5 LB: > { %s953_s17 = sadd.s32 4294967295, %s872_s16   ;;  %s728_s18 = sadd.s32 4294967294, %s872_s16   ;;  %s872_s16 = sphi %s938_s16, %s1130_s16   ;;  %s868_s15 = sphi %s936_s15, %s1129_s15   ;;  %s864_s14 = sphi %s934_s14, %s1128_s14   ;;  %s860_s13 = sphi %s932_s13, %s1127_s13  }
   0x6   : > { %s957_s19 = sadd.s32 1, %s872_s16   ;;  %s265_s20 = sadd.s32 1, %s868_s15 }
   0x7   : > { %s262_s21 = ssub.s32 %s872_s16, %s957_s19  ;;  %p275_p0 = scmp.ne.s32.totalorder %s868_s15, %s864_s14 }
   0x8   : > { %p263_p1 = scmp.eq.s32.totalorder %s262_s21, 0  ;;  %p276_p2 = scmp.eq.s32.totalorder %s953_s17, 1 }
   0x9   : > { %p281_p3 = scmp.ne.s32.totalorder %s864_s14, %s860_s13  ;;  %p282_p4 = scmp.eq.s32.totalorder %s728_s18, 1 }
   0xa   : > { %s968_s22 = scalar_select %p263_p1, %s868_s15, %s265_s20  }
   0xb   : > { %p970_p5 = por %p276_p2, %p275_p0  ;;  %p974_p6 = por %p282_p4, %p281_p3 }
   0xc   : > { %1122 = sst [smem:[#allocation6_spill]] %s968_s22  ;;  %p731_p7 = scmp.ge.s32.totalorder %s872_s16, 1 }
   0xd   : > { %p350_p8 = scmp.lt.s32.totalorder %s872_s16, 3 }
   0xf   : > { %p351_p9 = pnand %p731_p7, %p350_p8 }
  0x10   : > { %s1125_s5 = sld [smem:[#allocation7_spill]] (!%p351_p9)  ;;  %p403_p10 = scmp.lt.s32.totalorder (!%p351_p9), %s953_s17, 1 }
  0x11   : > { %354 = sbr.rel (%p351_p9) target bundleno = 429 (0x1ad), region = 60  ;;  %s874_s27 = smov (!%p351_p9), 32  }
  0x12   : > { %s875_s30 = smov (!%p351_p9), 96   ;;  %s760_s20 = sshll.u32 (!%p351_p9), %s953_s17, 3 }
  0x13   : > { %s616_s26 = scalar_lea.hbm (!%p351_p9), %s1120_s10, %s760_s20 }
  0x16   : > { %v763_v0 = vld [vmem:[%s1125_s5] sm:$0xff]  ;;  %v765_v1 = vld [vmem:[%s1125_s5 + $0x10] sm:$0xff]  ;;  %v764_v2 = vld [vmem:[%s1125_s5 + $0x8] sm:$0xff]  ;;  %vm532_vm0 = vcmask 1045504   ;;  %s994_s18 = scalar_select %p403_p10, %s953_s17, 1  ;;  %vm436_vm1 = vcmask 130048  }
  0x17   : > { %v527_v3 = vld [vmem:[%s1116_s6 + $0x18] sm:$0x3f]  ;;  %447 = vmatpush.bf16.msra.mxu3 %v763_v0  ;;  %511 = vmatpush.bf16.msra.mxu2 %v765_v1  ;;  %v526_v4 = vld [vmem:[%s1116_s6 + $0x10] sm:$0xff]  ;;  %v525_v5 = vld [vmem:[%s1116_s6 + $0x8] sm:$0xff]  ;;  %vm528_vm2 = vcmask 244736   ;;  %s876_s5 = smov 64  }
  0x18   : > { %479 = vmatpush.bf16.msra.mxu1 %v764_v2  ;;  %s735_s25 = sshll.u32 %s994_s18, 2  ;;  %v524_v9 = vld [vmem:[%s1116_s6] sm:$0xff]  ;;  %s733_s29 = sshll.u32 %s994_s18, 3  ;;  %v579_v11 = vld [vmem:[%s1118_s8 + $0x78] sm:$0xff]  ;;  %v578_v12 = vld [vmem:[%s1118_s8 + $0x70] sm:$0xff]  ;;  %vm425_vm3 = vcmask 261120  }
  0x19   : > { %s414_s28 = scalar_lea.vmem %s1112_s2, %s735_s25  ;;  %s422_s11 = scalar_lea.vmem %s1114_s4, %s735_s25  ;;  %584 = vmatpush.msra.mxu0 %v579_v11  ;;  %v577_v13 = vld [vmem:[%s1118_s8 + $0x68] sm:$0xff]  ;;  %v576_v14 = vld [vmem:[%s1118_s8 + $0x60] sm:$0xff]  ;;  %v575_v22 = vld [vmem:[%s1118_s8 + $0x58] sm:$0xff]  ;;  %vm457_vm4 = vcmask 523520   ;;  %vm489_vm5 = vcmask 785920   ;;  %vm521_vm6 = vcmask 1048320  }
  0x1a   : > { %v427_v6 = vld [vmem:[%s414_s28] sm:$0xf]  ;;  %s418_s22 = scalar_lea.vmem %s1113_s3, %s735_s25  ;;  %s410_s28 = scalar_lea.vmem %s1111_s1, %s733_s29  ;;  %v574_v23 = vld [vmem:[%s1118_s8 + $0x50] sm:$0xff]  ;;  %v573_v24 = vld [vmem:[%s1118_s8 + $0x48] sm:$0xff] }
  0x1b   : > { %757 = vmatpush.msk.msrb.mxu3 %vm532_vm0, %v527_v3  ;;  %v491_v7 = vld [vmem:[%s422_s11] sm:$0xf]  ;;  %585 = vmatpush.msra.mxu0 %v578_v12  ;;  %s406_s25 = scalar_lea.vmem %s1110_s0, %s733_s29  ;;  %v571_v26 = vld [vmem:[%s1118_s8 + $0x38] sm:$0xff]  ;;  %v570_v27 = vld [vmem:[%s1118_s8 + $0x30] sm:$0xff] }
  0x1c   : > { %742 = vmatmul.msk.bf16.vlgmr.msra.gmra.mxu3 %vm436_vm1, %v427_v6  ;;  %756 = vmatmul.msk.bf16.vlgmr.msra.gmra.mxu2 %vm436_vm1, %v491_v7  ;;  %v459_v8 = vld [vmem:[%s418_s22] sm:$0xf]  ;;  %v569_v28 = vld [vmem:[%s1118_s8 + $0x28] sm:$0xff]  ;;  %v567_v30 = vld [vmem:[%s1118_s8 + $0x18] sm:$0xff]  ;;  %s400_s22 = sand.u32 1, %s864_s14  }
  0x1d   : > { %549 = vmatpush.msrb.mxu3 %v526_v4  ;;  %749 = vmatmul.msk.bf16.vlgmr.msra.gmra.mxu1 %vm436_vm1, %v459_v8  ;;  %v523_v10 = vld [vmem:[%s410_s28] sm:$0xff]  ;;  %v566_v31 = vld [vmem:[%s1118_s8 + $0x10] sm:$0xff]  ;;  %v565_v32 = vld [vmem:[%s1118_s8 + $0x8] sm:$0xff]  ;;  %s732_s12 = sshll.u32 %s400_s22, 3  ;;  %s620_s28 = sshll.u32 %s616_s26, 4  ;;  %s621_s28 = int_to_ptr.hbm [resolvable:$true] %s620_s28 }
  0x1e   : > { %586 = vmatpush.msra.mxu0 %v577_v13  ;;  %v424_v21 = vld [vmem:[%s406_s25] sm:$0xff]  ;;  %s606_s11 = scalar_lea.sflag [#allocation4], %s400_s22  ;;  %s824_s17 = sshra.s32 %s621_s28, 4  ;;  %s825_s17 = int_to_ptr.hbm [resolvable:$true] %s824_s17 }
  0x1f   : > { %550 = vmatpush.msrb.mxu3 %v525_v5  ;;  %426 = vst.msk [vmem:[#allocation2] sm:$0xff] %vm425_vm3, %v424_v21  ;;  %v572_v25 = vld [vmem:[%s1118_s8 + $0x40] sm:$0xff]  ;;  %s826_s25 = scalar_lea.hbm %s825_s17, 8  ;;  %p831_p0 = scmp.lt.s32.totalorder %s825_s17, %s1120_s10 }
  0x20   : > { %587 = vmatpush.msra.mxu0 %v576_v14  ;;  %v568_v29 = vld [vmem:[%s1118_s8 + $0x20] sm:$0xff]  ;;  %p827_p11 = scmp.ne.s32.totalorder %s825_s17, %s826_s25 }
  0x21   : > { %551 = vmatpush.msrb.mxu3 %v524_v9  ;;  %v564_v33 = vld [vmem:[%s1118_s8] sm:$0xff] }
  0x22   : > { %588 = vmatpush.msra.mxu0 %v575_v22  ;;  %v808_v38 = vld [vmem:[%s1117_s7] ss:$0 sm:$0xff]  ;;  %p828_p12 = pnand %p827_p11, %p970_p5 }
  0x23   : > { %v809_v43 = vld [vmem:[%s1119_s9] ss:$0 sm:$0xff] }
  0x24   : > { %589 = vmatpush.msra.mxu0 %v574_v23  ;;  %p829_p13 = pneg %p828_p12 }
  0x26   : > { %590 = vmatpush.msra.mxu0 %v573_v24 }
  0x28   : > { %591 = vmatpush.msra.mxu0 %v572_v25 }
  0x2a   : > { %592 = vmatpush.msra.mxu0 %v571_v26 }
  0x2c   : > { %758 = vmatmul.msk.f32.vlgmr.msrb.gmra.mxu3 %vm528_vm2, %v523_v10  ;;  %593 = vmatpush.msra.mxu0 %v570_v27 }
  0x2e   : > { %594 = vmatpush.msra.mxu0 %v569_v28 }
  0x30   : > { %595 = vmatpush.msra.mxu0 %v568_v29 }
  0x32   : > { %596 = vmatpush.msra.mxu0 %v567_v30 }
  0x34   : > { %597 = vmatpush.msra.mxu0 %v566_v31 }
  0x36   : > { %598 = vmatpush.msra.mxu0 %v565_v32 }
  0x38   : > { %599 = vmatpush.msra.mxu0 %v564_v33 }
  0x9a   : > { %v481_v15 = vpop.f32.mrf.mxu1 }
  0x9f   : > { %v449_v16 = vpop.f32.mrf.mxu3  ;;  %v513_v17 = vpop.f32.mrf.mxu2 }
  0xa0   : > { %454 = vrot.lane.b32.xlu0 %v449_v16, %s874_s27  ;;  %518 = vrot.lane.b32.xlu1 %v513_v17, %s875_s30  ;;  %s402_s30 = scalar_lea.vmem [#allocation3], %s732_s12  ;;  %s830_s12 = scalar_lea.hbm %s1120_s10, 16 }
  0xa1   : > { %p832_p1 = scmp.lt.s32.totalorder %s830_s12, %s826_s25 }
  0xa2   : > { %v483_v18 = vpop.f32.mrf.mxu1 }
  0xa3   : > { %p833_p2 = por %p832_p1, %p831_p0 }
  0xa5   : > { %p834_p3 = pnand %p833_p2, %p829_p13 }
  0xa7   : > { %v451_v19 = vpop.f32.mrf.mxu3  ;;  %v515_v20 = vpop.f32.mrf.mxu2 }
  0xa8   : > { %486 = vrot.lane.b32.xlu0 %v481_v15, %s876_s5  ;;  %s618_s5 = sshll.u32 %s402_s30, 4  ;;  %s619_s5 = int_to_ptr.vmem [resolvable:$true] %s618_s5 }
  0xaf   : > { %v553_v37 = vpop.f32.mrf.mxu3 }
 0x112   : > { %v455_v34 = vpop.permute.xlu0 %454  ;;  %v519_v35 = vpop.permute.xlu1 %518 }
 0x113   : > { %458 = vst.msk [vmem:[#allocation2] sm:$0xff] %vm457_vm4, %v455_v34 }
 0x11a   : > { %v487_v36 = vpop.permute.xlu0 %486 }
 0x11b   : > { %490 = vst.msk [vmem:[#allocation2] sm:$0xff] %vm489_vm5, %v487_v36 }
 0x11c   : > { %522 = vst.msk [vmem:[#allocation2] sm:$0xff] %vm521_vm6, %v519_v35 }
 0x123   : > { %v556_v39 = vld [vmem:[#allocation2] sm:$0xff] }
 0x124   : > { %v557_v40 = vadd.f32 %v556_v39, %v553_v37 }
 0x126   : > { %v562_v41 = vadd.f32 %v808_v38, %v557_v40 }
 0x128   : > { %v563_v42 = vmax.f32 %v562_v41, 0.0 }
 0x12a   : > { %600 = vmatmul.f32.vlgmr.msra.gmra.mxu0 %v563_v42 }
 0x1a7   : > { %v601_v44 = vpop.f32.mrf.mxu0 }
 0x1a8   : > { %v602_v45 = vadd.f32 %v809_v43, %v601_v44 }
 0x1aa   : > { %604 = vst.msk [vmem:[%s402_s30] sm:$0xff] %vm425_vm3, %v602_v45 }
 0x1ab   : > { %837 = shalt.err (!%p834_p3)
}
 0x1ac   : > { %766 = dma.vmem_to_hbm [thread:$0]  (%p970_p5), %s619_s5, 128, %s621_s28, %s606_s11  }
 0x1ad PF: > { %p772_p4 = scmp.ge.s32.totalorder %s872_s16, 2  ;;  %s632_s22 = sand.u32 1, %s860_s13  }
 0x1ae   : > { %s633_s27 = scalar_lea.sflag [#allocation4], %s632_s22 }
 0x1af   : > { %p769_p7 = pnand %p772_p4, %p974_p6 }
 0x1b1   : > { %p770_p8 = pneg %p769_p7 }
 0x1b3   : > { %855 = dma.done.wait (%p770_p8), %s633_s27, 128  }
 0x1b4   : > { %857 = vsyncadd (%p770_p8), %s633_s27, 4294967168  ;;  %s1126_s29 = sld [smem:[#allocation6_spill]]  ;;  %p20_p9 = scmp.ge.s32.totalorder %s957_s19, 4  }
 0x1b5   : > { %s1127_s13 = smov %s864_s14  ;;  %s1128_s14 = smov %s868_s15 }
 0x1b6   : > { %s1130_s16 = smov %s957_s19  ;;  %22 = sbr.rel (!%p20_p9) target bundleno = 5 (0x5), region = 109 }
 0x1ba   : > { %s1129_s15 = smov %s1126_s29 }
 0x1bb   :  { %639 = vsyncpa [#allocation4], 1 }
 0x1bc   :  { %641 = vsyncpa [#allocation4 + $0x1], 1 }

</bundles_post_ra>
